<compile_context>
chip_gen: v7x
topology: tpu7x:2x2x1
jax: 0.10.0
libtpu: 0.0.40
codegen_flags: <defaults>
</compile_context>

<pallas_src>
import math
import functools

import jax
import jax.numpy as jnp
from jax import lax
from jax.experimental import pallas as pl
from jax.experimental.pallas import tpu as pltpu


# --------------------------- Fused forward kernel ---------------------------
def _make_fused_kernel(h, d_k, scale, has_bias, bias_heads):
    D = h * d_k
    contract_t = (((1,), (1,)), ((), ()))  # "qd,kd->qk"  (contract trailing dims)

    def kernel(*refs):
        if has_bias:
            (xq_ref, xk_ref, xv_ref, wqkv_ref, bqkv_ref,
             wo_ref, bo_ref, bias_ref, o_ref) = refs
        else:
            (xq_ref, xk_ref, xv_ref, wqkv_ref, bqkv_ref,
             wo_ref, bo_ref, o_ref) = refs
            bias_ref = None

        # Fused Q/K/V projections; everything below stays in VMEM / vregs.
        q_all = (jnp.dot(xq_ref[...], wqkv_ref[0],
                         preferred_element_type=jnp.float32) + bqkv_ref[0])
        k_all = (jnp.dot(xk_ref[...], wqkv_ref[1],
                         preferred_element_type=jnp.float32) + bqkv_ref[1])
        v_all = (jnp.dot(xv_ref[...], wqkv_ref[2],
                         preferred_element_type=jnp.float32) + bqkv_ref[2])

        sq = q_all.shape[0]
        acc = jnp.zeros((sq, D), jnp.float32)
        for head in range(h):                      # small static head loop
            lo = head * d_k
            qh = q_all[:, lo:lo + d_k]
            kh = k_all[:, lo:lo + d_k]
            vh = v_all[:, lo:lo + d_k]

            # scores = q @ k^T / sqrt(d_k)  (+ additive bias that already
            # encodes the mask as -1e30, avoiding the -inf NaN path)
            s = lax.dot_general(qh, kh, contract_t,
                                preferred_element_type=jnp.float32) * scale
            if has_bias:
                s = s + bias_ref[head if bias_heads > 1 else 0]

            m = jnp.max(s, axis=-1, keepdims=True)
            e = jnp.exp(s - m)
            p = e * pl.reciprocal(jnp.sum(e, axis=-1, keepdims=True),
                                  approx=True)
            # TODO(synk): nn.Dropout(p=0.1) is applied as identity (eval-mode
            # semantics); attention weights (self.attn) are not returned.

            ctx = jnp.dot(p, vh, preferred_element_type=jnp.float32)
            # Head-merge + output projection folded into an accumulate.
            acc = acc + jnp.dot(ctx, wo_ref[lo:lo + d_k, :],
                                preferred_element_type=jnp.float32)

        o_ref[...] = (acc + bo_ref[...]).astype(o_ref.dtype)

    return kernel


# ------------------------------- Module glue --------------------------------
def init_params(key, d_model):
    """Deterministic synthetic weights: 4 x Linear(d_model, d_model)."""
    keys = jax.random.split(key, 8)
    params = {}
    for idx, name in enumerate(("q", "k", "v", "o")):
        w = 0.1 * jax.random.normal(keys[2 * idx], (d_model, d_model), jnp.float32)
        b = 0.1 * jax.random.normal(keys[2 * idx + 1], (d_model,), jnp.float32)
        params[f"w_{name}"] = w  # stored as (in, out)
        params[f"b_{name}"] = b
    return params


@functools.partial(jax.jit, static_argnames=("h",))
def kg_multi_head_attention(params, query, key, value, h, mask=None, bias=None):
    """Forward pass of KGMultiHeadAttention (eval mode / no dropout)."""
    B, Sq, D = query.shape
    Sk = key.shape[1]
    d_k = D // h
    scale = 1.0 / math.sqrt(d_k)

    w_qkv = jnp.stack([params["w_q"], params["w_k"], params["w_v"]])            # (3, D, D)
    b_qkv = jnp.stack([params["b_q"], params["b_k"], params["b_v"]])[:, None]   # (3, 1, D)
    w_o = params["w_o"]
    b_o = params["b_o"].reshape(1, D)

    # Pre-combine mask + bias into a single additive bias (skipped entirely
    # when both are None; mask-only stays at head-dim 1).
    add_bias = None
    if bias is not None:
        add_bias = bias.astype(jnp.float32)
    if mask is not None:
        # PyTorch does mask.unsqueeze(1): (B, Sq, Sk) -> (B, 1, Sq, Sk)
        mask_add = jnp.where(mask[:, None, :, :] == 0,
                             jnp.float32(-1e30), jnp.float32(0.0))
        add_bias = mask_add if add_bias is None else add_bias + mask_add
    has_bias = add_bias is not None

    in_specs = [
        pl.BlockSpec((None, Sq, D), lambda b: (b, 0, 0)),   # query (per batch)
        pl.BlockSpec((None, Sk, D), lambda b: (b, 0, 0)),   # key
        pl.BlockSpec((None, Sk, D), lambda b: (b, 0, 0)),   # value
        pl.BlockSpec((3, D, D), lambda b: (0, 0, 0)),       # W_q/W_k/W_v stacked
        pl.BlockSpec((3, 1, D), lambda b: (0, 0, 0)),       # b_q/b_k/b_v stacked
        pl.BlockSpec((D, D), lambda b: (0, 0)),             # W_o
        pl.BlockSpec((1, D), lambda b: (0, 0)),             # b_o
    ]
    args = [query, key, value, w_qkv, b_qkv, w_o, b_o]

    bias_heads = 1
    if has_bias:
        bias_heads = add_bias.shape[1]                      # 1 (mask only) or h
        add_bias = jnp.broadcast_to(add_bias, (B, bias_heads, Sq, Sk))
        in_specs.append(
            pl.BlockSpec((None, bias_heads, Sq, Sk), lambda b: (b, 0, 0, 0)))
        args.append(add_bias)

    kernel = _make_fused_kernel(h, d_k, scale, has_bias, bias_heads)
    return pl.pallas_call(
        kernel,
        out_shape=jax.ShapeDtypeStruct((B, Sq, D), jnp.float32),
        grid=(B,),
        in_specs=in_specs,
        out_specs=pl.BlockSpec((None, Sq, D), lambda b: (b, 0, 0)),
        compiler_params=pltpu.CompilerParams(
            dimension_semantics=("parallel",)),
    )(*args)


# -------------------------------- Reference ---------------------------------
def reference(params, query, key, value, h, mask, bias):
    B, S, D = query.shape
    d_k = D // h

    def lin(x, w, b):
        return x @ w + b

    def proj(x, w, b):
        return jnp.transpose(lin(x, w, b).reshape(B, -1, h, d_k), (0, 2, 1, 3))

    q = proj(query, params["w_q"], params["b_q"])
    k = proj(key, params["w_k"], params["b_k"])
    v = proj(value, params["w_v"], params["b_v"])
    s = jnp.einsum("bhqd,bhkd->bhqk", q, k) / math.sqrt(d_k)
    if bias is not None:
        s = s + bias
    if mask is not None:
        s = jnp.where(mask[:, None, :, :] == 0, -jnp.inf, s)
    p = jax.nn.softmax(s, axis=-1)
    x = jnp.einsum("bhqk,bhkd->bhqd", p, v)
    x = jnp.transpose(x, (0, 2, 1, 3)).reshape(B, S, D)
    return lin(x, params["w_o"], params["b_o"])


# ----------------------------------- Main ------------------------------------
if __name__ == "__main__":
    B, S, H, D_MODEL = 2, 8, 4, 32

    root = jax.random.PRNGKey(0)
    k_params, k_q, k_k, k_v, k_mask, k_bias = jax.random.split(root, 6)

    params = init_params(k_params, D_MODEL)
    query = jax.random.normal(k_q, (B, S, D_MODEL), jnp.float32)
    key_in = jax.random.normal(k_k, (B, S, D_MODEL), jnp.float32)
    value = jax.random.normal(k_v, (B, S, D_MODEL), jnp.float32)

    # mask: (B, S, S), 1 = keep, 0 = masked; keep the diagonal so the reference
    # (which uses -inf) has no all-masked rows.
    mask = (jax.random.uniform(k_mask, (B, S, S)) > 0.3).astype(jnp.float32)
    mask = jnp.maximum(mask, jnp.eye(S, dtype=jnp.float32)[None])
    # bias: edge-relation bias added to attention scores, (B, H, S, S).
    bias = 0.1 * jax.random.normal(k_bias, (B, H, S, S), jnp.float32)

    out = kg_multi_head_attention(params, query, key_in, value, H,
                                  mask=mask, bias=bias)
    out = jax.block_until_ready(out)

    ref = reference(params, query, key_in, value, H, mask, bias)
    assert out.shape == (B, S, D_MODEL)
    # Slightly relaxed tolerance: pl.reciprocal(approx=True) in the softmax
    # denominator has ~2^-12 relative error.
    assert jnp.allclose(out, ref, atol=2e-3, rtol=2e-3), (
        f"max abs err = {jnp.max(jnp.abs(out - ref))}"
    )
    print("KERNEL_OK")
</pallas_src>

<mosaic_0001>
module attributes {stable_mosaic.version = 11 : i64} {
  func.func @kernel(%arg0: i32, %arg1: memref<1x8x32xf32, #tpu.memory_space<vmem>>, %arg2: memref<1x8x32xf32, #tpu.memory_space<vmem>>, %arg3: memref<1x8x32xf32, #tpu.memory_space<vmem>>, %arg4: memref<3x32x32xf32, #tpu.memory_space<vmem>>, %arg5: memref<3x1x32xf32, #tpu.memory_space<vmem>>, %arg6: memref<32x32xf32, #tpu.memory_space<vmem>>, %arg7: memref<1x32xf32, #tpu.memory_space<vmem>>, %arg8: memref<1x4x8x8xf32, #tpu.memory_space<vmem>>, %arg9: memref<1x8x32xf32, #tpu.memory_space<vmem>>) attributes {dimension_semantics = [#tpu.dimension_semantics<parallel>], iteration_bounds = array<i64: 2>, scalar_prefetch = 0 : i64, scratch_operands = 0 : i64, tpu.core_type = #tpu.core_type<tc>, window_params = [{transform_indices = @transform_0, window_bounds = array<i64: 1, 8, 32>}, {transform_indices = @transform_1, window_bounds = array<i64: 1, 8, 32>}, {transform_indices = @transform_2, window_bounds = array<i64: 1, 8, 32>}, {pipeline_mode = #tpu.pipeline_mode<synchronous>, transform_indices = @transform_3, window_bounds = array<i64: 3, 32, 32>}, {pipeline_mode = #tpu.pipeline_mode<synchronous>, transform_indices = @transform_4, window_bounds = array<i64: 3, 1, 32>}, {pipeline_mode = #tpu.pipeline_mode<synchronous>, transform_indices = @transform_5, window_bounds = array<i64: 32, 32>}, {pipeline_mode = #tpu.pipeline_mode<synchronous>, transform_indices = @transform_6, window_bounds = array<i64: 1, 32>}, {transform_indices = @transform_7, window_bounds = array<i64: 1, 4, 8, 8>}, {transform_indices = @transform_8, window_bounds = array<i64: 1, 8, 32>}]} {
    %c0 = arith.constant 0 : index
    %c0_0 = arith.constant 0 : index
    %c0_1 = arith.constant 0 : index
    %0 = vector.load %arg1[%c0, %c0_0, %c0_1] : memref<1x8x32xf32, #tpu.memory_space<vmem>>, vector<1x8x32xf32>
    %1 = vector.shape_cast %0 : vector<1x8x32xf32> to vector<8x32xf32>
    %c0_2 = arith.constant 0 : index
    %c0_3 = arith.constant 0 : index
    %c0_4 = arith.constant 0 : index
    %2 = vector.load %arg4[%c0_2, %c0_3, %c0_4] : memref<3x32x32xf32, #tpu.memory_space<vmem>>, vector<1x32x32xf32>
    %3 = vector.shape_cast %2 : vector<1x32x32xf32> to vector<32x32xf32>
    %cst = arith.constant dense<0.000000e+00> : vector<8x32xf32>
    %4 = tpu.matmul %1, %3, %cst {dimension_numbers = #tpu.dot_dimension_numbers<[1], [0], [0], [1], [0, 0, 1, 1], [], []>} : vector<8x32xf32>, vector<32x32xf32>, vector<8x32xf32> -> vector<8x32xf32>
    %c0_5 = arith.constant 0 : index
    %c0_6 = arith.constant 0 : index
    %c0_7 = arith.constant 0 : index
    %5 = vector.load %arg5[%c0_5, %c0_6, %c0_7] : memref<3x1x32xf32, #tpu.memory_space<vmem>>, vector<1x1x32xf32>
    %6 = vector.shape_cast %5 : vector<1x1x32xf32> to vector<1x32xf32>
    %7 = vector.broadcast %6 : vector<1x32xf32> to vector<8x32xf32>
    %8 = arith.addf %4, %7 : vector<8x32xf32>
    %c0_8 = arith.constant 0 : index
    %c0_9 = arith.constant 0 : index
    %c0_10 = arith.constant 0 : index
    %9 = vector.load %arg2[%c0_8, %c0_9, %c0_10] : memref<1x8x32xf32, #tpu.memory_space<vmem>>, vector<1x8x32xf32>
    %10 = vector.shape_cast %9 : vector<1x8x32xf32> to vector<8x32xf32>
    %c1 = arith.constant 1 : index
    %c0_11 = arith.constant 0 : index
    %c0_12 = arith.constant 0 : index
    %11 = vector.load %arg4[%c1, %c0_11, %c0_12] : memref<3x32x32xf32, #tpu.memory_space<vmem>>, vector<1x32x32xf32>
    %12 = vector.shape_cast %11 : vector<1x32x32xf32> to vector<32x32xf32>
    %cst_13 = arith.constant dense<0.000000e+00> : vector<8x32xf32>
    %13 = tpu.matmul %10, %12, %cst_13 {dimension_numbers = #tpu.dot_dimension_numbers<[1], [0], [0], [1], [0, 0, 1, 1], [], []>} : vector<8x32xf32>, vector<32x32xf32>, vector<8x32xf32> -> vector<8x32xf32>
    %c1_14 = arith.constant 1 : index
    %c0_15 = arith.constant 0 : index
    %c0_16 = arith.constant 0 : index
    %14 = vector.load %arg5[%c1_14, %c0_15, %c0_16] : memref<3x1x32xf32, #tpu.memory_space<vmem>>, vector<1x1x32xf32>
    %15 = vector.shape_cast %14 : vector<1x1x32xf32> to vector<1x32xf32>
    %16 = vector.broadcast %15 : vector<1x32xf32> to vector<8x32xf32>
    %17 = arith.addf %13, %16 : vector<8x32xf32>
    %c0_17 = arith.constant 0 : index
    %c0_18 = arith.constant 0 : index
    %c0_19 = arith.constant 0 : index
    %18 = vector.load %arg3[%c0_17, %c0_18, %c0_19] : memref<1x8x32xf32, #tpu.memory_space<vmem>>, vector<1x8x32xf32>
    %19 = vector.shape_cast %18 : vector<1x8x32xf32> to vector<8x32xf32>
    %c2 = arith.constant 2 : index
    %c0_20 = arith.constant 0 : index
    %c0_21 = arith.constant 0 : index
    %20 = vector.load %arg4[%c2, %c0_20, %c0_21] : memref<3x32x32xf32, #tpu.memory_space<vmem>>, vector<1x32x32xf32>
    %21 = vector.shape_cast %20 : vector<1x32x32xf32> to vector<32x32xf32>
    %cst_22 = arith.constant dense<0.000000e+00> : vector<8x32xf32>
    %22 = tpu.matmul %19, %21, %cst_22 {dimension_numbers = #tpu.dot_dimension_numbers<[1], [0], [0], [1], [0, 0, 1, 1], [], []>} : vector<8x32xf32>, vector<32x32xf32>, vector<8x32xf32> -> vector<8x32xf32>
    %c2_23 = arith.constant 2 : index
    %c0_24 = arith.constant 0 : index
    %c0_25 = arith.constant 0 : index
    %23 = vector.load %arg5[%c2_23, %c0_24, %c0_25] : memref<3x1x32xf32, #tpu.memory_space<vmem>>, vector<1x1x32xf32>
    %24 = vector.shape_cast %23 : vector<1x1x32xf32> to vector<1x32xf32>
    %25 = vector.broadcast %24 : vector<1x32xf32> to vector<8x32xf32>
    %26 = arith.addf %22, %25 : vector<8x32xf32>
    %cst_26 = arith.constant 0.000000e+00 : f32
    %27 = vector.broadcast %cst_26 : f32 to vector<8x32xf32>
    %28 = vector.extract_strided_slice %8 {offsets = [0, 0], sizes = [8, 8], strides = [1, 1]} : vector<8x32xf32> to vector<8x8xf32>
    %29 = vector.extract_strided_slice %17 {offsets = [0, 0], sizes = [8, 8], strides = [1, 1]} : vector<8x32xf32> to vector<8x8xf32>
    %30 = vector.extract_strided_slice %26 {offsets = [0, 0], sizes = [8, 8], strides = [1, 1]} : vector<8x32xf32> to vector<8x8xf32>
    %cst_27 = arith.constant dense<0.000000e+00> : vector<8x8xf32>
    %31 = tpu.matmul %28, %29, %cst_27 {dimension_numbers = #tpu.dot_dimension_numbers<[1], [1], [0], [0], [0, 0, 1, 0], [], []>} : vector<8x8xf32>, vector<8x8xf32>, vector<8x8xf32> -> vector<8x8xf32>
    %cst_28 = arith.constant 0.353553385 : f32
    %32 = vector.broadcast %cst_28 : f32 to vector<8x8xf32>
    %33 = arith.mulf %31, %32 : vector<8x8xf32>
    %c0_29 = arith.constant 0 : index
    %c0_30 = arith.constant 0 : index
    %c0_31 = arith.constant 0 : index
    %c0_32 = arith.constant 0 : index
    %34 = vector.load %arg8[%c0_29, %c0_30, %c0_31, %c0_32] : memref<1x4x8x8xf32, #tpu.memory_space<vmem>>, vector<1x1x8x8xf32>
    %35 = vector.shape_cast %34 : vector<1x1x8x8xf32> to vector<8x8xf32>
    %36 = arith.addf %33, %35 : vector<8x8xf32>
    %cst_33 = arith.constant dense<0xFF800000> : vector<8xf32>
    %37 = vector.multi_reduction <maximumf>, %36, %cst_33 [1] : vector<8x8xf32> to vector<8xf32>
    %38 = vector.shape_cast %37 : vector<8xf32> to vector<8x1xf32>
    %39 = vector.broadcast %38 : vector<8x1xf32> to vector<8x8xf32>
    %40 = arith.subf %36, %39 : vector<8x8xf32>
    %41 = math.exp %40 : vector<8x8xf32>
    %cst_34 = arith.constant dense<0.000000e+00> : vector<8xf32>
    %42 = vector.multi_reduction <add>, %41, %cst_34 [1] : vector<8x8xf32> to vector<8xf32>
    %43 = vector.shape_cast %42 : vector<8xf32> to vector<8x1xf32>
    %44 = tpu.reciprocal %43 {approx = true} : vector<8x1xf32> -> vector<8x1xf32>
    %45 = vector.broadcast %44 : vector<8x1xf32> to vector<8x8xf32>
    %46 = arith.mulf %41, %45 : vector<8x8xf32>
    %cst_35 = arith.constant dense<0.000000e+00> : vector<8x8xf32>
    %47 = tpu.matmul %46, %30, %cst_35 {dimension_numbers = #tpu.dot_dimension_numbers<[1], [0], [0], [1], [0, 0, 1, 1], [], []>} : vector<8x8xf32>, vector<8x8xf32>, vector<8x8xf32> -> vector<8x8xf32>
    %c0_36 = arith.constant 0 : index
    %c0_37 = arith.constant 0 : index
    %48 = vector.load %arg6[%c0_36, %c0_37] : memref<32x32xf32, #tpu.memory_space<vmem>>, vector<8x32xf32>
    %cst_38 = arith.constant dense<0.000000e+00> : vector<8x32xf32>
    %49 = tpu.matmul %47, %48, %cst_38 {dimension_numbers = #tpu.dot_dimension_numbers<[1], [0], [0], [1], [0, 0, 1, 1], [], []>} : vector<8x8xf32>, vector<8x32xf32>, vector<8x32xf32> -> vector<8x32xf32>
    %50 = arith.addf %27, %49 : vector<8x32xf32>
    %51 = vector.extract_strided_slice %8 {offsets = [0, 8], sizes = [8, 8], strides = [1, 1]} : vector<8x32xf32> to vector<8x8xf32>
    %52 = vector.extract_strided_slice %17 {offsets = [0, 8], sizes = [8, 8], strides = [1, 1]} : vector<8x32xf32> to vector<8x8xf32>
    %53 = vector.extract_strided_slice %26 {offsets = [0, 8], sizes = [8, 8], strides = [1, 1]} : vector<8x32xf32> to vector<8x8xf32>
    %cst_39 = arith.constant dense<0.000000e+00> : vector<8x8xf32>
    %54 = tpu.matmul %51, %52, %cst_39 {dimension_numbers = #tpu.dot_dimension_numbers<[1], [1], [0], [0], [0, 0, 1, 0], [], []>} : vector<8x8xf32>, vector<8x8xf32>, vector<8x8xf32> -> vector<8x8xf32>
    %cst_40 = arith.constant 0.353553385 : f32
    %55 = vector.broadcast %cst_40 : f32 to vector<8x8xf32>
    %56 = arith.mulf %54, %55 : vector<8x8xf32>
    %c0_41 = arith.constant 0 : index
    %c1_42 = arith.constant 1 : index
    %c0_43 = arith.constant 0 : index
    %c0_44 = arith.constant 0 : index
    %57 = vector.load %arg8[%c0_41, %c1_42, %c0_43, %c0_44] : memref<1x4x8x8xf32, #tpu.memory_space<vmem>>, vector<1x1x8x8xf32>
    %58 = vector.shape_cast %57 : vector<1x1x8x8xf32> to vector<8x8xf32>
    %59 = arith.addf %56, %58 : vector<8x8xf32>
    %cst_45 = arith.constant dense<0xFF800000> : vector<8xf32>
    %60 = vector.multi_reduction <maximumf>, %59, %cst_45 [1] : vector<8x8xf32> to vector<8xf32>
    %61 = vector.shape_cast %60 : vector<8xf32> to vector<8x1xf32>
    %62 = vector.broadcast %61 : vector<8x1xf32> to vector<8x8xf32>
    %63 = arith.subf %59, %62 : vector<8x8xf32>
    %64 = math.exp %63 : vector<8x8xf32>
    %cst_46 = arith.constant dense<0.000000e+00> : vector<8xf32>
    %65 = vector.multi_reduction <add>, %64, %cst_46 [1] : vector<8x8xf32> to vector<8xf32>
    %66 = vector.shape_cast %65 : vector<8xf32> to vector<8x1xf32>
    %67 = tpu.reciprocal %66 {approx = true} : vector<8x1xf32> -> vector<8x1xf32>
    %68 = vector.broadcast %67 : vector<8x1xf32> to vector<8x8xf32>
    %69 = arith.mulf %64, %68 : vector<8x8xf32>
    %cst_47 = arith.constant dense<0.000000e+00> : vector<8x8xf32>
    %70 = tpu.matmul %69, %53, %cst_47 {dimension_numbers = #tpu.dot_dimension_numbers<[1], [0], [0], [1], [0, 0, 1, 1], [], []>} : vector<8x8xf32>, vector<8x8xf32>, vector<8x8xf32> -> vector<8x8xf32>
    %c8 = arith.constant 8 : index
    %c0_48 = arith.constant 0 : index
    %71 = vector.load %arg6[%c8, %c0_48] : memref<32x32xf32, #tpu.memory_space<vmem>>, vector<8x32xf32>
    %cst_49 = arith.constant dense<0.000000e+00> : vector<8x32xf32>
    %72 = tpu.matmul %70, %71, %cst_49 {dimension_numbers = #tpu.dot_dimension_numbers<[1], [0], [0], [1], [0, 0, 1, 1], [], []>} : vector<8x8xf32>, vector<8x32xf32>, vector<8x32xf32> -> vector<8x32xf32>
    %73 = arith.addf %50, %72 : vector<8x32xf32>
    %74 = vector.extract_strided_slice %8 {offsets = [0, 16], sizes = [8, 8], strides = [1, 1]} : vector<8x32xf32> to vector<8x8xf32>
    %75 = vector.extract_strided_slice %17 {offsets = [0, 16], sizes = [8, 8], strides = [1, 1]} : vector<8x32xf32> to vector<8x8xf32>
    %76 = vector.extract_strided_slice %26 {offsets = [0, 16], sizes = [8, 8], strides = [1, 1]} : vector<8x32xf32> to vector<8x8xf32>
    %cst_50 = arith.constant dense<0.000000e+00> : vector<8x8xf32>
    %77 = tpu.matmul %74, %75, %cst_50 {dimension_numbers = #tpu.dot_dimension_numbers<[1], [1], [0], [0], [0, 0, 1, 0], [], []>} : vector<8x8xf32>, vector<8x8xf32>, vector<8x8xf32> -> vector<8x8xf32>
    %cst_51 = arith.constant 0.353553385 : f32
    %78 = vector.broadcast %cst_51 : f32 to vector<8x8xf32>
    %79 = arith.mulf %77, %78 : vector<8x8xf32>
    %c0_52 = arith.constant 0 : index
    %c2_53 = arith.constant 2 : index
    %c0_54 = arith.constant 0 : index
    %c0_55 = arith.constant 0 : index
    %80 = vector.load %arg8[%c0_52, %c2_53, %c0_54, %c0_55] : memref<1x4x8x8xf32, #tpu.memory_space<vmem>>, vector<1x1x8x8xf32>
    %81 = vector.shape_cast %80 : vector<1x1x8x8xf32> to vector<8x8xf32>
    %82 = arith.addf %79, %81 : vector<8x8xf32>
    %cst_56 = arith.constant dense<0xFF800000> : vector<8xf32>
    %83 = vector.multi_reduction <maximumf>, %82, %cst_56 [1] : vector<8x8xf32> to vector<8xf32>
    %84 = vector.shape_cast %83 : vector<8xf32> to vector<8x1xf32>
    %85 = vector.broadcast %84 : vector<8x1xf32> to vector<8x8xf32>
    %86 = arith.subf %82, %85 : vector<8x8xf32>
    %87 = math.exp %86 : vector<8x8xf32>
    %cst_57 = arith.constant dense<0.000000e+00> : vector<8xf32>
    %88 = vector.multi_reduction <add>, %87, %cst_57 [1] : vector<8x8xf32> to vector<8xf32>
    %89 = vector.shape_cast %88 : vector<8xf32> to vector<8x1xf32>
    %90 = tpu.reciprocal %89 {approx = true} : vector<8x1xf32> -> vector<8x1xf32>
    %91 = vector.broadcast %90 : vector<8x1xf32> to vector<8x8xf32>
    %92 = arith.mulf %87, %91 : vector<8x8xf32>
    %cst_58 = arith.constant dense<0.000000e+00> : vector<8x8xf32>
    %93 = tpu.matmul %92, %76, %cst_58 {dimension_numbers = #tpu.dot_dimension_numbers<[1], [0], [0], [1], [0, 0, 1, 1], [], []>} : vector<8x8xf32>, vector<8x8xf32>, vector<8x8xf32> -> vector<8x8xf32>
    %c16 = arith.constant 16 : index
    %c0_59 = arith.constant 0 : index
    %94 = vector.load %arg6[%c16, %c0_59] : memref<32x32xf32, #tpu.memory_space<vmem>>, vector<8x32xf32>
    %cst_60 = arith.constant dense<0.000000e+00> : vector<8x32xf32>
    %95 = tpu.matmul %93, %94, %cst_60 {dimension_numbers = #tpu.dot_dimension_numbers<[1], [0], [0], [1], [0, 0, 1, 1], [], []>} : vector<8x8xf32>, vector<8x32xf32>, vector<8x32xf32> -> vector<8x32xf32>
    %96 = arith.addf %73, %95 : vector<8x32xf32>
    %97 = vector.extract_strided_slice %8 {offsets = [0, 24], sizes = [8, 8], strides = [1, 1]} : vector<8x32xf32> to vector<8x8xf32>
    %98 = vector.extract_strided_slice %17 {offsets = [0, 24], sizes = [8, 8], strides = [1, 1]} : vector<8x32xf32> to vector<8x8xf32>
    %99 = vector.extract_strided_slice %26 {offsets = [0, 24], sizes = [8, 8], strides = [1, 1]} : vector<8x32xf32> to vector<8x8xf32>
    %cst_61 = arith.constant dense<0.000000e+00> : vector<8x8xf32>
    %100 = tpu.matmul %97, %98, %cst_61 {dimension_numbers = #tpu.dot_dimension_numbers<[1], [1], [0], [0], [0, 0, 1, 0], [], []>} : vector<8x8xf32>, vector<8x8xf32>, vector<8x8xf32> -> vector<8x8xf32>
    %cst_62 = arith.constant 0.353553385 : f32
    %101 = vector.broadcast %cst_62 : f32 to vector<8x8xf32>
    %102 = arith.mulf %100, %101 : vector<8x8xf32>
    %c0_63 = arith.constant 0 : index
    %c3 = arith.constant 3 : index
    %c0_64 = arith.constant 0 : index
    %c0_65 = arith.constant 0 : index
    %103 = vector.load %arg8[%c0_63, %c3, %c0_64, %c0_65] : memref<1x4x8x8xf32, #tpu.memory_space<vmem>>, vector<1x1x8x8xf32>
    %104 = vector.shape_cast %103 : vector<1x1x8x8xf32> to vector<8x8xf32>
    %105 = arith.addf %102, %104 : vector<8x8xf32>
    %cst_66 = arith.constant dense<0xFF800000> : vector<8xf32>
    %106 = vector.multi_reduction <maximumf>, %105, %cst_66 [1] : vector<8x8xf32> to vector<8xf32>
    %107 = vector.shape_cast %106 : vector<8xf32> to vector<8x1xf32>
    %108 = vector.broadcast %107 : vector<8x1xf32> to vector<8x8xf32>
    %109 = arith.subf %105, %108 : vector<8x8xf32>
    %110 = math.exp %109 : vector<8x8xf32>
    %cst_67 = arith.constant dense<0.000000e+00> : vector<8xf32>
    %111 = vector.multi_reduction <add>, %110, %cst_67 [1] : vector<8x8xf32> to vector<8xf32>
    %112 = vector.shape_cast %111 : vector<8xf32> to vector<8x1xf32>
    %113 = tpu.reciprocal %112 {approx = true} : vector<8x1xf32> -> vector<8x1xf32>
    %114 = vector.broadcast %113 : vector<8x1xf32> to vector<8x8xf32>
    %115 = arith.mulf %110, %114 : vector<8x8xf32>
    %cst_68 = arith.constant dense<0.000000e+00> : vector<8x8xf32>
    %116 = tpu.matmul %115, %99, %cst_68 {dimension_numbers = #tpu.dot_dimension_numbers<[1], [0], [0], [1], [0, 0, 1, 1], [], []>} : vector<8x8xf32>, vector<8x8xf32>, vector<8x8xf32> -> vector<8x8xf32>
    %c24 = arith.constant 24 : index
    %c0_69 = arith.constant 0 : index
    %117 = vector.load %arg6[%c24, %c0_69] : memref<32x32xf32, #tpu.memory_space<vmem>>, vector<8x32xf32>
    %cst_70 = arith.constant dense<0.000000e+00> : vector<8x32xf32>
    %118 = tpu.matmul %116, %117, %cst_70 {dimension_numbers = #tpu.dot_dimension_numbers<[1], [0], [0], [1], [0, 0, 1, 1], [], []>} : vector<8x8xf32>, vector<8x32xf32>, vector<8x32xf32> -> vector<8x32xf32>
    %119 = arith.addf %96, %118 : vector<8x32xf32>
    %c0_71 = arith.constant 0 : index
    %c0_72 = arith.constant 0 : index
    %120 = vector.load %arg7[%c0_71, %c0_72] : memref<1x32xf32, #tpu.memory_space<vmem>>, vector<1x32xf32>
    %121 = vector.broadcast %120 : vector<1x32xf32> to vector<8x32xf32>
    %122 = arith.addf %119, %121 : vector<8x32xf32>
    %c0_73 = arith.constant 0 : index
    %c0_74 = arith.constant 0 : index
    %c0_75 = arith.constant 0 : index
    %123 = vector.load %arg9[%c0_73, %c0_74, %c0_75] : memref<1x8x32xf32, #tpu.memory_space<vmem>>, vector<1x8x32xf32>
    %124 = vector.shape_cast %123 : vector<1x8x32xf32> to vector<8x32xf32>
    %125 = vector.shape_cast %122 : vector<8x32xf32> to vector<1x8x32xf32>
    tpu.vector_store %arg9[%c0_73, %c0_74, %c0_75], %125 {strides = array<i32>} : memref<1x8x32xf32, #tpu.memory_space<vmem>>, vector<1x8x32xf32>,
    return
  }
  func.func @transform_0(%arg0: i32) -> (i32, i32, i32) {
    %c0_i32 = arith.constant 0 : i32
    %c0_i32_0 = arith.constant 0 : i32
    %c0_i32_1 = arith.constant 0 : i32
    return %arg0, %c0_i32, %c0_i32_0 : i32, i32, i32
  }
  func.func @transform_1(%arg0: i32) -> (i32, i32, i32) {
    %c0_i32 = arith.constant 0 : i32
    %c0_i32_0 = arith.constant 0 : i32
    %c0_i32_1 = arith.constant 0 : i32
    return %arg0, %c0_i32, %c0_i32_0 : i32, i32, i32
  }
  func.func @transform_2(%arg0: i32) -> (i32, i32, i32) {
    %c0_i32 = arith.constant 0 : i32
    %c0_i32_0 = arith.constant 0 : i32
    %c0_i32_1 = arith.constant 0 : i32
    return %arg0, %c0_i32, %c0_i32_0 : i32, i32, i32
  }
  func.func @transform_3(%arg0: i32) -> (i32, i32, i32) {
    %c0_i32 = arith.constant 0 : i32
    %c0_i32_0 = arith.constant 0 : i32
    %c0_i32_1 = arith.constant 0 : i32
    %c0_i32_2 = arith.constant 0 : i32
    return %c0_i32, %c0_i32_0, %c0_i32_1 : i32, i32, i32
  }
  func.func @transform_4(%arg0: i32) -> (i32, i32, i32) {
    %c0_i32 = arith.constant 0 : i32
    %c0_i32_0 = arith.constant 0 : i32
    %c0_i32_1 = arith.constant 0 : i32
    %c0_i32_2 = arith.constant 0 : i32
    return %c0_i32, %c0_i32_0, %c0_i32_1 : i32, i32, i32
  }
  func.func @transform_5(%arg0: i32) -> (i32, i32) {
    %c0_i32 = arith.constant 0 : i32
    %c0_i32_0 = arith.constant 0 : i32
    %c0_i32_1 = arith.constant 0 : i32
    return %c0_i32, %c0_i32_0 : i32, i32
  }
  func.func @transform_6(%arg0: i32) -> (i32, i32) {
    %c0_i32 = arith.constant 0 : i32
    %c0_i32_0 = arith.constant 0 : i32
    %c0_i32_1 = arith.constant 0 : i32
    return %c0_i32, %c0_i32_0 : i32, i32
  }
  func.func @transform_7(%arg0: i32) -> (i32, i32, i32, i32) {
    %c0_i32 = arith.constant 0 : i32
    %c0_i32_0 = arith.constant 0 : i32
    %c0_i32_1 = arith.constant 0 : i32
    %c0_i32_2 = arith.constant 0 : i32
    return %arg0, %c0_i32, %c0_i32_0, %c0_i32_1 : i32, i32, i32, i32
  }
  func.func @transform_8(%arg0: i32) -> (i32, i32, i32) {
    %c0_i32 = arith.constant 0 : i32
    %c0_i32_0 = arith.constant 0 : i32
    %c0_i32_1 = arith.constant 0 : i32
    return %arg0, %c0_i32, %c0_i32_0 : i32, i32, i32
  }
}

</mosaic_0001>

<bundles_post_ra>
// kernel: kg_multi_head_attention.1
= control target key start
LH: loop header
LB: loop body
LE: loop exit
PB: predicated region body
PF: predicated region fallthrough
CT: control target
= control target key end

     0   :  { %13 = vsyncpa [#allocation3], 0  ;;  %s2348_s0 = inlined_call_operand.vmem [shape: f32[2,8,32], index: 0, kind: input, shape index: {}]   ;;  %s2349_s1 = inlined_call_operand.vmem [shape: f32[2,8,32], index: 1, kind: input, shape index: {}]   ;;  %s2350_s2 = inlined_call_operand.vmem [shape: f32[2,8,32], index: 2, kind: input, shape index: {}]   ;;  %s2351_s3 = inlined_call_operand.vmem [shape: f32[3,32,32], index: 3, kind: input, shape index: {}]   ;;  %s2352_s4 = inlined_call_operand.vmem [shape: f32[3,1,32], index: 4, kind: input, shape index: {}]   ;;  %s2353_s5 = inlined_call_operand.vmem [shape: f32[32,32], index: 5, kind: input, shape index: {}]   ;;  %s2354_s6 = inlined_call_operand.vmem [shape: f32[1,32], index: 6, kind: input, shape index: {}]   ;;  %s2355_s7 = inlined_call_operand.vmem [shape: f32[2,4,8,8], index: 7, kind: input, shape index: {}]   ;;  %s2356_s8 = inlined_call_operand.hbm [shape: f32[2,8,32], index: 8, kind: output, shape index: {}]  }
   0x1   :  { %15 = vsyncpa [#allocation3 + $0x1], 0  ;;  %s2081_s27 = smov 0   ;;  %s2083_s28 = smov 0  }
   0x2   :  { %s2085_s29 = smov 0   ;;  %s2087_s30 = smov 0  }
   0x3 LB: > { %s2102_s9 = sadd.s32 4294967295, %s2027_s30   ;;  %s1703_s10 = sadd.s32 4294967294, %s2027_s30   ;;  %s2027_s30 = sphi %s2087_s30, %s2362_s30   ;;  %s2023_s29 = sphi %s2085_s29, %s2361_s29   ;;  %s2019_s28 = sphi %s2083_s28, %s2360_s28   ;;  %s2015_s27 = sphi %s2081_s27, %s2359_s27  }
   0x4   : > { %s2106_s11 = sadd.s32 1, %s2027_s30   ;;  %s216_s12 = sadd.s32 1, %s2023_s29 }
   0x5   : > { %s213_s13 = ssub.s32 %s2027_s30, %s2106_s11  ;;  %p226_p0 = scmp.ne.s32.totalorder %s2023_s29, %s2019_s28 }
   0x6   : > { %p214_p1 = scmp.eq.s32.totalorder %s213_s13, 0  ;;  %p227_p2 = scmp.eq.s32.totalorder %s2102_s9, 1 }
   0x7   : > { %p232_p3 = scmp.ne.s32.totalorder %s2019_s28, %s2015_s27  ;;  %p233_p4 = scmp.eq.s32.totalorder %s1703_s10, 1 }
   0x8   : > { %s2117_s14 = scalar_select %p214_p1, %s2023_s29, %s216_s12  }
   0x9   : > { %p2119_p5 = por %p227_p2, %p226_p0  ;;  %p2123_p6 = por %p233_p4, %p232_p3 }
   0xa   : > { %p1706_p7 = scmp.ge.s32.totalorder %s2027_s30, 1  ;;  %p292_p8 = scmp.lt.s32.totalorder %s2027_s30, 3 }
   0xc   : > { %p293_p9 = pnand %p1706_p7, %p292_p8 }
   0xd   : > { %v1715_v0 = vld [vmem:[%s2351_s3 + $0x20] sm:$0xff] (!%p293_p9)  ;;  %v1716_v1 = vld [vmem:[%s2351_s3 + $0x28] sm:$0xff] (!%p293_p9)  ;;  %v2029_v3 = vmov (!%p293_p9), 0.0|0.0   ;;  %v1717_v6 = vld [vmem:[%s2351_s3 + $0x30] sm:$0xff] (!%p293_p9)  ;;  %p338_p10 = scmp.lt.s32.totalorder (!%p293_p9), %s2102_s9, 1  ;;  %vm2030_vm0 = vmmov (!%p293_p9), 0  }
   0xe   : > { %296 = sbr.rel (%p293_p9) target bundleno = 2611 (0xa33), region = 52  ;;  %v356_v2 = vld [vmem:[%s2351_s3] sm:$0xff] (!%p293_p9)  ;;  %1892 = vmatprep.subr.bf16.mxu1 (!%p293_p9), %v2029_v3  ;;  %v1893_v4 = vpack.c.bf16 (!%p293_p9), %v1716_v1, %v1715_v0  ;;  %1886 = vmatprep.subr.bf16.mxu0 (!%p293_p9), %v2029_v3  ;;  %v357_v5 = vld [vmem:[%s2351_s3 + $0x8] sm:$0xff] (!%p293_p9)  ;;  %v1718_v7 = vld [vmem:[%s2351_s3 + $0x38] sm:$0xff] (!%p293_p9)  ;;  %v2031_v9 = vmov (!%p293_p9), 0.0   ;;  %vm367_vm1 = vcmask (!%p293_p9), 261120  }
   0xf   : > { %v1887_v8 = vpack.c.bf16 (!%p293_p9), %v357_v5, %v356_v2  ;;  %1812 = vmatprep.mubr.msk.f32.mxu1 (!%p293_p9), %vm2030_vm0, %v2031_v9  ;;  %v358_v10 = vld [vmem:[%s2351_s3 + $0x10] sm:$0xff] (!%p293_p9)  ;;  %v359_v11 = vld [vmem:[%s2351_s3 + $0x18] sm:$0xff] (!%p293_p9)  ;;  %1801 = vmatprep.mubr.msk.f32.mxu0 (!%p293_p9), %vm2030_vm0, %v2031_v9  ;;  %v1896_v12 = vpack.c.bf16 (!%p293_p9), %v1718_v7, %v1717_v6  ;;  %v1722_v16 = vld [vmem:[%s2351_s3 + $0x40] sm:$0xff] (!%p293_p9)  ;;  %vm615_vm2 = vcmask (!%p293_p9), 64512  }
  0x10   : > { %1894 = vmatpush3.bf16.msra.mxu1 (!%p293_p9), %v1893_v4  ;;  %v1890_v13 = vpack.c.bf16 (!%p293_p9), %v359_v11, %v358_v10  ;;  %v1723_v17 = vld [vmem:[%s2351_s3 + $0x48] sm:$0xff] (!%p293_p9)  ;;  %v1724_v18 = vld [vmem:[%s2351_s3 + $0x50] sm:$0xff] (!%p293_p9)  ;;  %v1725_v20 = vld [vmem:[%s2351_s3 + $0x58] sm:$0xff] (!%p293_p9) }
  0x11   : > { %1888 = vmatpush3.bf16.msra.mxu0 (!%p293_p9), %v1887_v8  ;;  %1895 = vmatprep.subr.bf16.mxu1 (!%p293_p9), %v2029_v3  ;;  %v1899_v19 = vpack.c.bf16 (!%p293_p9), %v1723_v17, %v1722_v16  ;;  %v1902_v21 = vpack.c.bf16 (!%p293_p9), %v1725_v20, %v1724_v18  ;;  %v1720_v23 = vld [vmem:[%s2352_s4 + $0x1] ss:$0 sm:$0xff] (!%p293_p9)  ;;  %v1713_v24 = vld [vmem:[%s2352_s4] ss:$0 sm:$0xff] (!%p293_p9)  ;;  %v1727_v33 = vld [vmem:[%s2352_s4 + $0x2] ss:$0 sm:$0xff] (!%p293_p9) }
  0x12   : > { %1889 = vmatprep.subr.bf16.mxu0 (!%p293_p9), %v2029_v3  ;;  %v950_v62 = vld [vmem:[%s2353_s5 + $0x8] sm:$0xff] (!%p293_p9) }
  0x14   : > { %1897 = vmatpush3.bf16.msra.mxu1 (!%p293_p9), %v1896_v12 }
  0x15   : > { %s2159_s20 = scalar_select %p338_p10, %s2102_s9, 1  ;;  %1891 = vmatpush3.bf16.msra.mxu0 %v1890_v13  ;;  %1826 = vmatprep.subr.mxu1 %v2031_v9 }
  0x16   : > { %1898 = vmatprep.subr.bf16.mxu0 %v2029_v3 }
  0x17   : > { %s1708_s21 = sshll.u32 %s2159_s20, 3  ;;  %s1753_s23 = sshll.u32 %s2159_s20, 5 }
  0x18   : > { %s345_s24 = scalar_lea.vmem %s2349_s1, %s1708_s21  ;;  %s341_s10 = scalar_lea.vmem %s2348_s0, %s1708_s21 }
  0x19   : > { %v441_v14 = vld [vmem:[%s345_s24] sm:$0xff]  ;;  %s2227_s26 = scalar_lea.vmem %s2355_s7, %s1753_s23  ;;  %s2033_s20 = smov 112  }
  0x1a   : > { %v355_v15 = vld [vmem:[%s341_s10] sm:$0xff]  ;;  %1813 = vmatmul.mubr.msk.f32.vlgmr.msra.gmra.mrb[0].mxu1 %vm367_vm1, %v441_v14  ;;  %s349_s10 = scalar_lea.vmem %s2350_s2, %s1708_s21  ;;  %s2032_s21 = smov 120   ;;  %v1734_v44 = vld [vmem:[%s2227_s26 + $0x8] sm:$0xff]  ;;  %v1740_v18 = vld [vmem:[%s2227_s26 + $0x10] sm:$0xff] }
  0x1b   : > { %1802 = vmatmul.mubr.msk.f32.vlgmr.msra.gmra.mrb[0].mxu0 %vm367_vm1, %v355_v15  ;;  %1828 = vmatprep.mubr.msk.f32.mxu1 %vm2030_vm0, %v2031_v9  ;;  %v528_v22 = vld [vmem:[%s349_s10] sm:$0xff]  ;;  %s2034_s10 = smov 104   ;;  %s335_s24 = sand.u32 1, %s2019_s28  }
  0x1c   : > { %1823 = vmatprep.mubr.msk.f32.mxu0 %vm2030_vm0, %v2031_v9  ;;  %1900 = vmatpush3.bf16.msra.mxu0 %v1899_v19  ;;  %v693_v38 = vld [vmem:[%s2227_s26] sm:$0xff]  ;;  %s1707_s25 = sshll.u32 %s335_s24, 3  ;;  %s1595_s19 = scalar_lea.sflag [#allocation3], %s335_s24 }
  0x1d   : > { %1901 = vmatprep.subr.bf16.mxu0 %v2029_v3  ;;  %v779_v3 = vld [vmem:[%s2353_s5] sm:$0xff]  ;;  %s337_s12 = scalar_lea.vmem [#allocation2], %s1707_s25 }
  0x1e   : > { %s1608_s13 = sshll.u32 %s337_s12, 4  ;;  %s2307_s13 = int_to_ptr.vmem [resolvable:$true] %s1608_s13 }
  0x1f   : > { %s1965_s22 = scalar_lea.vmem %s2307_s13, 128 }
  0x20   : > { %1903 = vmatpush3.bf16.msra.mxu0 %v1902_v21  ;;  %p1966_p11 = scmp.ne.s32.totalorder %s2307_s13, %s1965_s22 }
  0x21   : > { %1836 = vmatprep.subr.mxu0 %v2031_v9 }
  0x22   : > { %p1967_p12 = pnand %p1966_p11, %p2119_p5 }
  0x23   : > { %1824 = vmatmul.mubr.msk.f32.vlgmr.msra.gmra.mrb[2].mxu0 %vm367_vm1, %v528_v22 }
  0x24   : > { %1838 = vmatprep.mubr.msk.f32.mxu0 %vm2030_vm0, %v2031_v9  ;;  %p1968_p13 = pneg %p1967_p12 }
  0xed   : > { %v524_v25 = vpop.f32.mrb[0].mxu1 }
  0xee   : > { %v525_v26 = vadd.f32 %v1720_v23, %v524_v25  ;;  %v1814_v27 = vpop.f32.mrb[1].mxu1  ;;  %v437_v28 = vpop.f32.mrb[0].mxu0 }
  0xef   : > { %v2200_v29 = vadd.f32 %v1713_v24, %v437_v28  ;;  %v1803_v30 = vpop.f32.mrb[1].mxu0 }
  0xf0   : > { %782 = vrot.lane.b32.xlu0 %v525_v26, %s2032_s21  ;;  %1827 = vmatpush3.xpose.msk.msra.mxu1 %vm615_vm2, %v525_v26 }
  0xf1   : > { %1831 = vmatprep.subr.mxu1 %v2031_v9 }
  0xf3   : > { %1829 = vmatmul.mubr.msk.f32.vlgmr.msra.gmra.mrb[2].mxu1 %vm615_vm2, %v2200_v29 }
  0xf4   : > { %780 = vrot.lane.b32.xlu0 %v2200_v29, %s2032_s21  ;;  %1833 = vmatprep.mubr.msk.f32.mxu1 %vm2030_vm0, %v2031_v9 }
  0xf6   : > { %v611_v34 = vpop.f32.mrb[2].mxu0 }
  0xf7   : > { %v2219_v35 = vadd.f32 %v1727_v33, %v611_v34  ;;  %v1825_v36 = vpop.f32.mrb[3].mxu0 }
  0xf9   : > { %1832 = vmatpush3.msra.mxu1 %v2219_v35 }
  0xfa   : > { %1841 = vmatprep.subr.mxu1 %v2031_v9 }
 0x162   : > { %v783_v31 = vpop.permute.xlu0 %782 }
 0x163   : > { %1837 = vmatpush3.xpose.msk.msra.mxu0 %vm615_vm2, %v783_v31 }
 0x164   : > { %1846 = vmatprep.subr.mxu0 %v2031_v9 }
 0x166   : > { %v781_v32 = vpop.permute.xlu0 %780 }
 0x167   : > { %1839 = vmatmul.mubr.msk.f32.vlgmr.msra.gmra.mrb[4].mxu0 %vm615_vm2, %v781_v32 }
 0x168   : > { %1848 = vmatprep.mubr.msk.f32.mxu0 %vm2030_vm0, %v2031_v9  ;;  %1847 = vmatpush3.msra.mxu0 %v950_v62 }
 0x169   : > { %1856 = vmatprep.subr.mxu0 %v2031_v9 }
 0x1c6   : > { %v688_v37 = vpop.f32.mrb[2].mxu1 }
 0x1c7   : > { %v692_v39 = vmul.f32 0.35355338, %v688_v37  ;;  %v1830_v40 = vpop.f32.mrb[3].mxu1 }
 0x1c9   : > { %v694_v41 = vadd.f32 %v693_v38, %v692_v39  ;;  %v1745_v38 = vld [vmem:[%s2227_s26 + $0x18] sm:$0xff] }
 0x1cb   : > { %v695_v42 = vsel %vm615_vm2, %v694_v41, -inf }
 0x1cc   : > { %696 = vmax.xlane.f32.xlu1 %v695_v42 }
 0x23a   : > { %v854_v43 = vpop.f32.mrb[4].mxu0 }
 0x23b   : > { %v858_v45 = vmul.f32 0.35355338, %v854_v43  ;;  %v1840_v46 = vpop.f32.mrb[5].mxu0 }
 0x23d   : > { %v861_v47 = vadd.f32 %v1734_v44, %v858_v45 }
 0x23f   : > { %v862_v48 = vsel %vm615_vm2, %v861_v47, -inf }
 0x240   : > { %863 = vmax.xlane.f32.xlu1 %v862_v48 }
 0x259   : > { %v697_v49 = vpop.xlane.xlu1 %696 }
 0x25a   : > { %v698_v50 = vsub.f32 %v694_v41, %v697_v49 }
 0x25c   : > { %v699_v51 = vmul.f32 1.442695, %v698_v50 }
 0x25e   : > { %1949 = vpow2.f32 %v699_v51 }
 0x268   : > { %v1950_v52 = vpop.eup %1949 }
 0x269   : > { %v701_v53 = vsel %vm615_vm2, %v1950_v52, 0.0 }
 0x26a   : > { %702 = vadd.xlane.f32.xlu0 %v701_v53 }
 0x280   : > { %1190 = vrot.lane.b32.xlu0 %v2219_v35, %s2033_s20 }
 0x284   : > { %1343 = vrot.lane.b32.xlu0 %v525_v26, %s2034_s10 }
 0x2cd   : > { %v864_v54 = vpop.xlane.xlu1 %863 }
 0x2ce   : > { %v865_v55 = vsub.f32 %v861_v47, %v864_v54 }
 0x2d0   : > { %v866_v56 = vmul.f32 1.442695, %v865_v55 }
 0x2d2   : > { %1951 = vpow2.f32 %v866_v56 }
 0x2dc   : > { %v1952_v57 = vpop.eup %1951 }
 0x2dd   : > { %v868_v58 = vsel %vm615_vm2, %v1952_v57, 0.0 }
 0x2de   : > { %869 = vadd.xlane.f32.xlu1 %v868_v58 }
 0x2ef   : > { %874 = vrot.lane.b32.xlu1 %v2219_v35, %s2032_s21 }
 0x2f3   : > { %1099 = vrot.lane.b32.xlu1 %v525_v26, %s2033_s20 }
 0x2f7   : > { %v703_v59 = vpop.xlane.xlu0 %702  ;;  %1097 = vrot.lane.b32.xlu1 %v2200_v29, %s2033_s20 }
 0x2f8   : > { %1953 = vrcp.f32 %v703_v59 }
 0x2fb   : > { %v1191_v5 = vpop.permute.xlu0 %1190 }
 0x2ff   : > { %v1344_v28 = vpop.permute.xlu0 %1343 }
 0x302   : > { %v1954_v60 = vpop.eup %1953 }
 0x303   : > { %v705_v61 = vmul.f32 %v1954_v60, %v1950_v52 }
 0x305   : > { %1834 = vmatmul.mubr.msk.f32.vlgmr.msra.gmra.mrb[4].mxu1 %vm615_vm2, %v705_v61 }
 0x306   : > { %1843 = vmatprep.mubr.msk.f32.mxu1 %vm2030_vm0, %v2031_v9 }
 0x36b   : > { %v870_v63 = vpop.xlane.xlu1 %869 }
 0x36c   : > { %1955 = vrcp.f32 %v870_v63 }
 0x36f   : > { %v875_v0 = vpop.permute.xlu1 %874 }
 0x370   : > { %1842 = vmatpush3.msra.mxu1 %v875_v0 }
 0x371   : > { %1851 = vmatprep.subr.mxu1 %v2031_v9 }
 0x373   : > { %v1100_v7 = vpop.permute.xlu1 %1099 }
 0x376   : > { %v1956_v1 = vpop.eup %1955 }
 0x377   : > { %v872_v2 = vmul.f32 %v1956_v1, %v1952_v57  ;;  %v1098_v11 = vpop.permute.xlu1 %1097  ;;  %v1748_v57 = vld [vmem:[%s2354_s6] ss:$0 sm:$0xff] }
 0x379   : > { %1844 = vmatmul.mubr.msk.f32.vlgmr.msra.gmra.mrb[6].mxu1 %vm615_vm2, %v872_v2 }
 0x37a   : > { %1852 = vmatpush3.msra.mxu1 %v779_v3  ;;  %1853 = vmatprep.mubr.msk.f32.mxu1 %vm2030_vm0, %v2031_v9 }
 0x37b   : > { %1861 = vmatprep.subr.mxu1 %v2031_v9 }
 0x3d8   : > { %v775_v4 = vpop.f32.mrb[4].mxu1 }
 0x3d9   : > { %v1835_v6 = vpop.f32.mrb[5].mxu1  ;;  %1854 = vmatmul.mubr.msk.f32.vlgmr.msra.gmra.mrb[8].mxu1 %vm615_vm2, %v775_v4 }
 0x3da   : > { %1862 = vmatpush3.msra.mxu1 %v1191_v5  ;;  %1863 = vmatprep.mubr.msk.f32.mxu1 %vm2030_vm0, %v2031_v9 }
 0x3db   : > { %1871 = vmatprep.subr.mxu1 %v2031_v9 }
 0x44c   : > { %v946_v8 = vpop.f32.mrb[6].mxu1 }
 0x44d   : > { %v1845_v10 = vpop.f32.mrb[7].mxu1  ;;  %1849 = vmatmul.mubr.msk.f32.vlgmr.msra.gmra.mrb[6].mxu0 %vm615_vm2, %v946_v8 }
 0x44e   : > { %1857 = vmatpush3.xpose.msk.msra.mxu0 %vm615_vm2, %v1100_v7  ;;  %1858 = vmatprep.mubr.msk.f32.mxu0 %vm2030_vm0, %v2031_v9 }
 0x44f   : > { %1866 = vmatprep.subr.mxu0 %v2031_v9 }
 0x451   : > { %1859 = vmatmul.mubr.msk.f32.vlgmr.msra.gmra.mrb[8].mxu0 %vm615_vm2, %v1098_v11 }
 0x452   : > { %1868 = vmatprep.mubr.msk.f32.mxu0 %vm2030_vm0, %v2031_v9 }
 0x4ac   : > { %v1093_v12 = vpop.f32.mrb[8].mxu1 }
 0x4ad   : > { %v1855_v13 = vpop.f32.mrb[9].mxu1 }
 0x520   : > { %v1020_v14 = vpop.f32.mrb[6].mxu0 }
 0x521   : > { %v1094_v15 = vadd.f32 %v1093_v12, %v1020_v14  ;;  %v1850_v16 = vpop.f32.mrb[7].mxu0 }
 0x524   : > { %v1171_v17 = vpop.f32.mrb[8].mxu0 }
 0x525   : > { %v1175_v19 = vmul.f32 0.35355338, %v1171_v17  ;;  %v1860_v20 = vpop.f32.mrb[9].mxu0 }
 0x527   : > { %v1178_v21 = vadd.f32 %v1740_v18, %v1175_v19 }
 0x529   : > { %v1179_v22 = vsel %vm615_vm2, %v1178_v21, -inf }
 0x52a   : > { %1180 = vmax.xlane.f32.xlu1 %v1179_v22 }
 0x5b7   : > { %v1181_v23 = vpop.xlane.xlu1 %1180 }
 0x5b8   : > { %v1182_v24 = vsub.f32 %v1178_v21, %v1181_v23 }
 0x5ba   : > { %v1183_v25 = vmul.f32 1.442695, %v1182_v24 }
 0x5bc   : > { %1957 = vpow2.f32 %v1183_v25 }
 0x5c6   : > { %v1958_v26 = vpop.eup %1957 }
 0x5c7   : > { %v1185_v27 = vsel %vm615_vm2, %v1958_v26, 0.0 }
 0x5c8   : > { %1186 = vadd.xlane.f32.xlu0 %v1185_v27 }
 0x5de   : > { %1341 = vrot.lane.b32.xlu0 %v2200_v29, %s2034_s10  ;;  %v1266_v29 = vld [vmem:[%s2353_s5 + $0x10] sm:$0xff] }
 0x5df   : > { %1867 = vmatpush3.msra.mxu0 %v1266_v29 }
 0x5e0   : > { %1876 = vmatprep.subr.mxu0 %v2031_v9 }
 0x655   : > { %v1187_v30 = vpop.xlane.xlu0 %1186 }
 0x656   : > { %1959 = vrcp.f32 %v1187_v30 }
 0x659   : > { %v1342_v33 = vpop.permute.xlu0 %1341 }
 0x660   : > { %v1960_v31 = vpop.eup %1959 }
 0x661   : > { %v1189_v32 = vmul.f32 %v1960_v31, %v1958_v26 }
 0x663   : > { %1864 = vmatmul.mubr.msk.f32.vlgmr.msra.gmra.mrb[10].mxu1 %vm615_vm2, %v1189_v32 }
 0x664   : > { %1872 = vmatpush3.xpose.msk.msra.mxu1 %vm615_vm2, %v1344_v28  ;;  %1873 = vmatprep.mubr.msk.f32.mxu1 %vm2030_vm0, %v2031_v9 }
 0x665   : > { %1881 = vmatprep.subr.mxu1 %v2031_v9 }
 0x667   : > { %1874 = vmatmul.mubr.msk.f32.vlgmr.msra.gmra.mrb[12].mxu1 %vm615_vm2, %v1342_v33 }
 0x668   : > { %1883 = vmatprep.mubr.msk.f32.mxu1 %vm2030_vm0, %v2031_v9 }
 0x736   : > { %v1262_v34 = vpop.f32.mrb[10].mxu1 }
 0x737   : > { %v1865_v36 = vpop.f32.mrb[11].mxu1  ;;  %1869 = vmatmul.mubr.msk.f32.vlgmr.msra.gmra.mrb[10].mxu0 %vm615_vm2, %v1262_v34 }
 0x738   : > { %1878 = vmatprep.mubr.msk.f32.mxu0 %vm2030_vm0, %v2031_v9  ;;  %v1510_v9 = vld [vmem:[%s2353_s5 + $0x18] sm:$0xff] }
 0x739   : > { %1882 = vmatpush3.msra.mxu1 %v1510_v9 }
 0x73a   : > { %v1415_v37 = vpop.f32.mrb[12].mxu1 }
 0x73b   : > { %v1419_v39 = vmul.f32 0.35355338, %v1415_v37  ;;  %v1875_v40 = vpop.f32.mrb[13].mxu1 }
 0x73d   : > { %v1422_v41 = vadd.f32 %v1745_v38, %v1419_v39 }
 0x73f   : > { %v1423_v42 = vsel %vm615_vm2, %v1422_v41, -inf }
 0x740   : > { %1424 = vmax.xlane.f32.xlu0 %v1423_v42 }
 0x7cd   : > { %v1425_v43 = vpop.xlane.xlu0 %1424 }
 0x7ce   : > { %v1426_v44 = vsub.f32 %v1422_v41, %v1425_v43 }
 0x7d0   : > { %v1427_v45 = vmul.f32 1.442695, %v1426_v44 }
 0x7d2   : > { %1961 = vpow2.f32 %v1427_v45 }
 0x7dc   : > { %v1962_v46 = vpop.eup %1961 }
 0x7dd   : > { %v1429_v47 = vsel %vm615_vm2, %v1962_v46, 0.0 }
 0x7de   : > { %1430 = vadd.xlane.f32.xlu1 %v1429_v47 }
 0x7ef   : > { %1434 = vrot.lane.b32.xlu1 %v2219_v35, %s2034_s10  ;;  %s1750_s10 = sshll.u32 %s2102_s9, 7  ;;  %s2035_s9 = smov [#allocation2]  }
 0x7f0   : > { %s2305_s21 = scalar_lea.hbm %s2356_s8, %s1750_s10  ;;  %s1969_s23 = sshll.u32 %s2035_s9, 4  ;;  %s1970_s23 = int_to_ptr.vmem [resolvable:$false] %s1969_s23 }
 0x7f1   : > { %s1971_s25 = scalar_lea.vmem %s1970_s23, 256  ;;  %p1972_p0 = scmp.lt.s32.totalorder %s2307_s13, %s1970_s23 }
 0x7f2   : > { %p1973_p1 = scmp.lt.s32.totalorder %s1971_s25, %s1965_s22 }
 0x7f4   : > { %p1974_p2 = por %p1973_p1, %p1972_p0 }
 0x7f6   : > { %p1975_p3 = pnand %p1974_p2, %p1968_p13 }
 0x80a   : > { %v1336_v48 = vpop.f32.mrb[10].mxu0 }
 0x80b   : > { %v1340_v49 = vadd.f32 %v1336_v48, %v1094_v15  ;;  %v1870_v50 = vpop.f32.mrb[11].mxu0 }
 0x86b   : > { %v1431_v51 = vpop.xlane.xlu1 %1430 }
 0x86c   : > { %1963 = vrcp.f32 %v1431_v51 }
 0x86f   : > { %v1435_v52 = vpop.permute.xlu1 %1434 }
 0x870   : > { %1877 = vmatpush3.msra.mxu0 %v1435_v52 }
 0x876   : > { %v1964_v53 = vpop.eup %1963 }
 0x877   : > { %v1433_v54 = vmul.f32 %v1964_v53, %v1962_v46 }
 0x879   : > { %1879 = vmatmul.mubr.msk.f32.vlgmr.msra.gmra.mrb[12].mxu0 %vm615_vm2, %v1433_v54 }
 0x94c   : > { %v1506_v55 = vpop.f32.mrb[12].mxu0 }
 0x94d   : > { %v1880_v35 = vpop.f32.mrb[13].mxu0  ;;  %1884 = vmatmul.mubr.msk.f32.vlgmr.msra.gmra.mrb[14].mxu1 %vm615_vm2, %v1506_v55 }
 0xa20   : > { %v1580_v56 = vpop.f32.mrb[14].mxu1 }
 0xa21   : > { %v1584_v58 = vadd.f32 %v1580_v56, %v1340_v49  ;;  %v1885_v59 = vpop.f32.mrb[15].mxu1 }
 0xa23   : > { %v1592_v60 = vadd.f32 %v1748_v57, %v1584_v58 }
 0xa25   : > { %1593 = vst.msk [vmem:[%s337_s12] sm:$0xff] %vm367_vm1, %v1592_v60 }
 0xa26   : > { %1978 = shalt.err (!%p1975_p3)
}
 0xa27   : > { %s1979_s24 = scalar_lea.hbm %s2305_s21, 128  ;;  %s1983_s10 = scalar_lea.hbm %s2356_s8, 256 }
 0xa28   : > { %p1980_p4 = scmp.ne.s32.totalorder %s2305_s21, %s1979_s24  ;;  %p1984_p9 = scmp.lt.u32.totalorder %s2305_s21, %s2356_s8 }
 0xa29   : > { %p1985_p10 = scmp.lt.u32.totalorder %s1983_s10, %s1979_s24  ;;  %p1987_p12 = scmp.lt.u32.totalorder %s1979_s24, %s2305_s21 }
 0xa2a   : > { %p1981_p7 = pnand %p1980_p4, %p2119_p5 }
 0xa2b   : > { %p1986_p11 = por %p1985_p10, %p1984_p9 }
 0xa2c   : > { %p1982_p8 = pneg %p1981_p7 }
 0xa2d   : > { %p1988_p13 = por %p1987_p12, %p1986_p11 }
 0xa2f   : > { %p1989_p0 = pnand %p1988_p13, %p1982_p8 }
 0xa31   : > { %1992 = shalt.err (!%p1989_p0)
}
 0xa32   : > { %1904 = dma.vmem_to_hbm [thread:$0]  (%p2119_p5), %s2307_s13, 128, %s2305_s21, %s1595_s19  }
 0xa33 PF: > { %p1910_p1 = scmp.ge.s32.totalorder %s2027_s30, 2  ;;  %s1620_s18 = sand.u32 1, %s2015_s27  }
 0xa34   : > { %s1621_s22 = scalar_lea.sflag [#allocation3], %s1620_s18 }
 0xa35   : > { %p1907_p2 = pnand %p1910_p1, %p2123_p6 }
 0xa37   : > { %2010 = dma.done.wait (!%p1907_p2), %s1621_s22, 128  }
 0xa38   : > { %2012 = vsyncadd (!%p1907_p2), %s1621_s22, 4294967168  ;;  %p18_p3 = scmp.ge.s32.totalorder %s2106_s11, 4   ;;  %s2359_s27 = smov %s2019_s28 }
 0xa39   : > { %s2360_s28 = smov %s2023_s29  ;;  %s2361_s29 = smov %s2117_s14 }
 0xa3a   : > { %s2362_s30 = smov %s2106_s11  ;;  %20 = sbr.rel (!%p18_p3) target bundleno = 3 (0x3), region = 103 }
 0xa41   :  { %1626 = vsyncpa [#allocation3], 1 }
 0xa42   :  { %1628 = vsyncpa [#allocation3 + $0x1], 1 }

</bundles_post_ra>
